<compile_context>
chip_gen: v6e
topology: v6e:2x2x1
jax: 0.10.0
libtpu: 0.0.40
codegen_flags: <defaults>
</compile_context>

<pallas_src>
import functools

import jax
import jax.numpy as jnp
from jax.experimental import pallas as pl
from jax.experimental.pallas import tpu as pltpu


def _autoencoder_kernel(x_ref,
                        w1, w2, w3, w4, w5, w6,   # bf16 weights, (in, out)
                        b_ref,                    # packed f32 biases, (8, >=128)
                        o_ref):
    """Fused 6-layer MLP. Matmuls on the MXU with bf16 operands / f32 accumulate,
    bias/ReLU on the VPU in f32, exp + approximate reciprocal (sigmoid) on the EUP."""
    b = b_ref[...]                                 # (8, Wmax) f32, loaded once
    h = x_ref[...].astype(jnp.bfloat16)            # bf16 operand for the MXU

    def layer(h_bf16, w_ref, row, width, relu):
        y = jnp.dot(h_bf16, w_ref[...], preferred_element_type=jnp.float32)
        y = y + b[row:row + 1, :width]             # static lane-0 slice, broadcasts over rows
        if relu:
            return jnp.maximum(y, 0.0).astype(jnp.bfloat16)
        return y                                   # keep final pre-activation in f32

    # encoder
    h = layer(h, w1, 0, 64, True)
    h = layer(h, w2, 1, 32, True)
    h = layer(h, w3, 2, 16, True)
    # decoder
    h = layer(h, w4, 3, 32, True)
    h = layer(h, w5, 4, 64, True)
    z = layer(h, w6, 5, o_ref.shape[-1], False)

    # sigmoid(z) = 1 / (1 + exp(-z)); clamp so exp never overflows into the approx recip.
    z = jnp.clip(z, -30.0, 30.0)
    o_ref[...] = pl.reciprocal(1.0 + jnp.exp(-z), approx=True).astype(o_ref.dtype)


def _round_up(n, m):
    return ((n + m - 1) // m) * m


def _choose_batch_tile(B, cap=1024):
    """Pick a batch tile (multiple of 8) and the padded batch size (multiple of the tile).

    Large tiles amortize the ~0.35 us per-grid-step overhead (cap default 1024; sweep
    256/512/1024/2048 if tuning). Once the padded batch reaches 256 the tile is halved so
    the 'parallel' batch axis has >= 2 grid steps and both v7x TensorCores run (measured
    no-op on single-TC v5e/v6e)."""
    if B > cap:
        bt = cap
    else:
        bt = _round_up(B, 8)
        if bt >= 256:
            bt = _round_up(bt // 2, 8)
    return bt, _round_up(B, bt)


def autoencoder_forward(x, params, *, batch_tile_cap=1024):
    """x: (B, input_dim) float32. params: list of (W, b) per layer, W=(in, out), b=(1, out)."""
    B, D = x.shape
    n_layers = len(params)
    D_pad = _round_up(D, 128)                      # lane-dense input/output feature axis
    bt, B_pad = _choose_batch_tile(B, batch_tile_cap)
    grid = (B_pad // bt,)

    x_p = x
    if (B_pad, D_pad) != (B, D):
        x_p = jnp.pad(x, ((0, B_pad - B), (0, D_pad - D)))

    # Prepare params: bf16 weights (first layer's rows / last layer's cols zero-padded to
    # D_pad), biases packed into one (8, Wmax) f32 array — one sublane per layer.
    ws, bias_vecs = [], []
    for li, (w, b) in enumerate(params):
        din, dout = w.shape
        if li == 0 and din != D_pad:
            w = jnp.pad(w, ((0, D_pad - din), (0, 0)))
        if li == n_layers - 1 and dout != D_pad:
            w = jnp.pad(w, ((0, 0), (0, D_pad - dout)))
            b = jnp.pad(b, ((0, 0), (0, D_pad - dout)))
        ws.append(w.astype(jnp.bfloat16))
        bias_vecs.append(b.reshape(-1).astype(jnp.float32))

    wmax = max(128, max(v.shape[0] for v in bias_vecs))
    b_packed = jnp.zeros((8, wmax), jnp.float32)
    for i, v in enumerate(bias_vecs):
        b_packed = b_packed.at[i, :v.shape[0]].set(v)

    # x / out tiled over the batch axis only; weights & packed bias use constant block
    # indices so the pipeline keeps the same (double-buffered) block every grid step.
    x_spec = pl.BlockSpec((bt, D_pad), lambda i: (i, 0))
    out_spec = pl.BlockSpec((bt, D_pad), lambda i: (i, 0))
    w_specs = [pl.BlockSpec(w.shape, lambda i: (0, 0)) for w in ws]
    b_spec = pl.BlockSpec(b_packed.shape, lambda i: (0, 0))

    param_bytes = sum(int(w.size) * w.dtype.itemsize for w in ws) + int(b_packed.size) * 4
    flops_per_row = 2 * sum(int(w.shape[0]) * int(w.shape[1]) for w in ws)
    cost = pl.CostEstimate(
        flops=int(B_pad) * flops_per_row,
        transcendentals=2 * int(B_pad) * int(D_pad),          # exp + reciprocal per output
        bytes_accessed=2 * int(B_pad) * int(D_pad) * 4 + param_bytes,
    )

    out = pl.pallas_call(
        _autoencoder_kernel,
        out_shape=jax.ShapeDtypeStruct((B_pad, D_pad), x.dtype),
        grid_spec=pltpu.PrefetchScalarGridSpec(
            num_scalar_prefetch=0,
            grid=grid,
            in_specs=[x_spec] + w_specs + [b_spec],
            out_specs=out_spec,
        ),
        compiler_params=pltpu.CompilerParams(
            dimension_semantics=("parallel",),     # batch axis shards across v7x TCs
            vmem_limit_bytes=32 * 1024 * 1024,     # explicit (v5e scoped default is 16 MiB)
        ),
        cost_estimate=cost,
    )(x_p, *ws, b_packed)

    if (B_pad, D_pad) != (B, D):
        out = out[:B, :D]
    return out


def init_params(key, input_dim):
    """Deterministic init matching PyTorch nn.Linear default: U(-1/sqrt(in), 1/sqrt(in))."""
    dims = [(input_dim, 64), (64, 32), (32, 16),      # encoder
            (16, 32), (32, 64), (64, input_dim)]      # decoder
    params = []
    for (din, dout) in dims:
        key, kw, kb = jax.random.split(key, 3)
        bound = 1.0 / jnp.sqrt(din)
        w = jax.random.uniform(kw, (din, dout), jnp.float32, -bound, bound)
        b = jax.random.uniform(kb, (1, dout), jnp.float32, -bound, bound)
        params.append((w, b))
    return params


def reference_forward(x, params, matmul_dtype=jnp.float32):
    """Pure-JAX reference. matmul_dtype=bf16 mirrors the kernel's MXU numerics
    (f32 accumulate, f32 bias/ReLU, exact sigmoid)."""
    h = x
    n = len(params)
    for i, (w, b) in enumerate(params):
        y = jnp.dot(h.astype(matmul_dtype), w.astype(matmul_dtype),
                    preferred_element_type=jnp.float32) + b
        h = jnp.maximum(y, 0.0) if i < n - 1 else jax.nn.sigmoid(y)
    return h


if __name__ == "__main__":
    key = jax.random.PRNGKey(0)
    batch, input_dim = 16, 32

    kx, kp = jax.random.split(key)
    x = jax.random.uniform(kx, (batch, input_dim), jnp.float32)   # MinMax-scaled data in [0,1]
    params = init_params(kp, input_dim)

    # Toy case: single grid step, feature axis padded 32 -> 128.
    out = jax.block_until_ready(autoencoder_forward(x, params))
    assert out.shape == (batch, input_dim)
    # Tight check vs a reference that mirrors the kernel's bf16-operand matmuls
    # (residual error = EUP approximate reciprocal, << 1e-3 on a sigmoid output).
    ref_bf16 = reference_forward(x, params, matmul_dtype=jnp.bfloat16)
    assert jnp.allclose(out, ref_bf16, atol=3e-3, rtol=3e-3), "mismatch vs bf16-matmul reference"
    # Loose check vs the full-f32 reference (bounds the bf16 operand-rounding error).
    ref_f32 = reference_forward(x, params, matmul_dtype=jnp.float32)
    assert jnp.allclose(out, ref_f32, atol=3e-2, rtol=3e-2), "mismatch vs f32 reference"

    # Ragged, larger batch: exercises batch padding and the >=2-step (dual-TC) grid path.
    xb = jax.random.uniform(jax.random.PRNGKey(1), (600, input_dim), jnp.float32)
    outb = jax.block_until_ready(autoencoder_forward(xb, params))
    refb = reference_forward(xb, params, matmul_dtype=jnp.bfloat16)
    assert outb.shape == (600, input_dim)
    assert jnp.allclose(outb, refb, atol=3e-3, rtol=3e-3), "mismatch vs reference (padded/tiled batch)"

    print("KERNEL_OK")
</pallas_src>

<mosaic_0001>
module attributes {stable_mosaic.version = 11 : i64} {
  func.func @_autoencoder_kernel(%arg0: i32, %arg1: memref<16x128xf32, #tpu.memory_space<vmem>>, %arg2: memref<128x64xbf16, #tpu.memory_space<vmem>>, %arg3: memref<64x32xbf16, #tpu.memory_space<vmem>>, %arg4: memref<32x16xbf16, #tpu.memory_space<vmem>>, %arg5: memref<16x32xbf16, #tpu.memory_space<vmem>>, %arg6: memref<32x64xbf16, #tpu.memory_space<vmem>>, %arg7: memref<64x128xbf16, #tpu.memory_space<vmem>>, %arg8: memref<8x128xf32, #tpu.memory_space<vmem>>, %arg9: memref<16x128xf32, #tpu.memory_space<vmem>>) attributes {dimension_semantics = [#tpu.dimension_semantics<parallel>], iteration_bounds = array<i64: 1>, scalar_prefetch = 0 : i64, scratch_operands = 0 : i64, tpu.core_type = #tpu.core_type<tc>, window_params = [{transform_indices = @transform_0, window_bounds = array<i64: 16, 128>}, {pipeline_mode = #tpu.pipeline_mode<synchronous>, transform_indices = @transform_1, window_bounds = array<i64: 128, 64>}, {pipeline_mode = #tpu.pipeline_mode<synchronous>, transform_indices = @transform_2, window_bounds = array<i64: 64, 32>}, {pipeline_mode = #tpu.pipeline_mode<synchronous>, transform_indices = @transform_3, window_bounds = array<i64: 32, 16>}, {pipeline_mode = #tpu.pipeline_mode<synchronous>, transform_indices = @transform_4, window_bounds = array<i64: 16, 32>}, {pipeline_mode = #tpu.pipeline_mode<synchronous>, transform_indices = @transform_5, window_bounds = array<i64: 32, 64>}, {pipeline_mode = #tpu.pipeline_mode<synchronous>, transform_indices = @transform_6, window_bounds = array<i64: 64, 128>}, {pipeline_mode = #tpu.pipeline_mode<synchronous>, transform_indices = @transform_7, window_bounds = array<i64: 8, 128>}, {transform_indices = @transform_8, window_bounds = array<i64: 16, 128>}]} {
    %c0 = arith.constant 0 : index
    %c0_0 = arith.constant 0 : index
    %0 = vector.load %arg8[%c0, %c0_0] : memref<8x128xf32, #tpu.memory_space<vmem>>, vector<8x128xf32>
    %c0_1 = arith.constant 0 : index
    %c0_2 = arith.constant 0 : index
    %1 = vector.load %arg1[%c0_1, %c0_2] : memref<16x128xf32, #tpu.memory_space<vmem>>, vector<16x128xf32>
    %2 = arith.truncf %1 : vector<16x128xf32> to vector<16x128xbf16>
    %c0_3 = arith.constant 0 : index
    %c0_4 = arith.constant 0 : index
    %3 = vector.load %arg2[%c0_3, %c0_4] : memref<128x64xbf16, #tpu.memory_space<vmem>>, vector<128x64xbf16>
    %cst = arith.constant dense<0.000000e+00> : vector<16x64xf32>
    %4 = tpu.matmul %2, %3, %cst {dimension_numbers = #tpu.dot_dimension_numbers<[1], [0], [0], [1], [0, 0, 1, 1], [], []>} : vector<16x128xbf16>, vector<128x64xbf16>, vector<16x64xf32> -> vector<16x64xf32>
    %5 = vector.extract_strided_slice %0 {offsets = [0, 0], sizes = [1, 64], strides = [1, 1]} : vector<8x128xf32> to vector<1x64xf32>
    %6 = vector.broadcast %5 : vector<1x64xf32> to vector<16x64xf32>
    %7 = arith.addf %4, %6 : vector<16x64xf32>
    %cst_5 = arith.constant 0.000000e+00 : f32
    %8 = vector.broadcast %cst_5 : f32 to vector<16x64xf32>
    %9 = arith.maximumf %7, %8 : vector<16x64xf32>
    %10 = arith.truncf %9 : vector<16x64xf32> to vector<16x64xbf16>
    %c0_6 = arith.constant 0 : index
    %c0_7 = arith.constant 0 : index
    %11 = vector.load %arg3[%c0_6, %c0_7] : memref<64x32xbf16, #tpu.memory_space<vmem>>, vector<64x32xbf16>
    %cst_8 = arith.constant dense<0.000000e+00> : vector<16x32xf32>
    %12 = tpu.matmul %10, %11, %cst_8 {dimension_numbers = #tpu.dot_dimension_numbers<[1], [0], [0], [1], [0, 0, 1, 1], [], []>} : vector<16x64xbf16>, vector<64x32xbf16>, vector<16x32xf32> -> vector<16x32xf32>
    %13 = vector.extract_strided_slice %0 {offsets = [1, 0], sizes = [1, 32], strides = [1, 1]} : vector<8x128xf32> to vector<1x32xf32>
    %14 = vector.broadcast %13 : vector<1x32xf32> to vector<16x32xf32>
    %15 = arith.addf %12, %14 : vector<16x32xf32>
    %cst_9 = arith.constant 0.000000e+00 : f32
    %16 = vector.broadcast %cst_9 : f32 to vector<16x32xf32>
    %17 = arith.maximumf %15, %16 : vector<16x32xf32>
    %18 = arith.truncf %17 : vector<16x32xf32> to vector<16x32xbf16>
    %c0_10 = arith.constant 0 : index
    %c0_11 = arith.constant 0 : index
    %19 = vector.load %arg4[%c0_10, %c0_11] : memref<32x16xbf16, #tpu.memory_space<vmem>>, vector<32x16xbf16>
    %cst_12 = arith.constant dense<0.000000e+00> : vector<16x16xf32>
    %20 = tpu.matmul %18, %19, %cst_12 {dimension_numbers = #tpu.dot_dimension_numbers<[1], [0], [0], [1], [0, 0, 1, 1], [], []>} : vector<16x32xbf16>, vector<32x16xbf16>, vector<16x16xf32> -> vector<16x16xf32>
    %21 = vector.extract_strided_slice %0 {offsets = [2, 0], sizes = [1, 16], strides = [1, 1]} : vector<8x128xf32> to vector<1x16xf32>
    %22 = vector.broadcast %21 : vector<1x16xf32> to vector<16x16xf32>
    %23 = arith.addf %20, %22 : vector<16x16xf32>
    %cst_13 = arith.constant 0.000000e+00 : f32
    %24 = vector.broadcast %cst_13 : f32 to vector<16x16xf32>
    %25 = arith.maximumf %23, %24 : vector<16x16xf32>
    %26 = arith.truncf %25 : vector<16x16xf32> to vector<16x16xbf16>
    %c0_14 = arith.constant 0 : index
    %c0_15 = arith.constant 0 : index
    %27 = vector.load %arg5[%c0_14, %c0_15] : memref<16x32xbf16, #tpu.memory_space<vmem>>, vector<16x32xbf16>
    %cst_16 = arith.constant dense<0.000000e+00> : vector<16x32xf32>
    %28 = tpu.matmul %26, %27, %cst_16 {dimension_numbers = #tpu.dot_dimension_numbers<[1], [0], [0], [1], [0, 0, 1, 1], [], []>} : vector<16x16xbf16>, vector<16x32xbf16>, vector<16x32xf32> -> vector<16x32xf32>
    %29 = vector.extract_strided_slice %0 {offsets = [3, 0], sizes = [1, 32], strides = [1, 1]} : vector<8x128xf32> to vector<1x32xf32>
    %30 = vector.broadcast %29 : vector<1x32xf32> to vector<16x32xf32>
    %31 = arith.addf %28, %30 : vector<16x32xf32>
    %cst_17 = arith.constant 0.000000e+00 : f32
    %32 = vector.broadcast %cst_17 : f32 to vector<16x32xf32>
    %33 = arith.maximumf %31, %32 : vector<16x32xf32>
    %34 = arith.truncf %33 : vector<16x32xf32> to vector<16x32xbf16>
    %c0_18 = arith.constant 0 : index
    %c0_19 = arith.constant 0 : index
    %35 = vector.load %arg6[%c0_18, %c0_19] : memref<32x64xbf16, #tpu.memory_space<vmem>>, vector<32x64xbf16>
    %cst_20 = arith.constant dense<0.000000e+00> : vector<16x64xf32>
    %36 = tpu.matmul %34, %35, %cst_20 {dimension_numbers = #tpu.dot_dimension_numbers<[1], [0], [0], [1], [0, 0, 1, 1], [], []>} : vector<16x32xbf16>, vector<32x64xbf16>, vector<16x64xf32> -> vector<16x64xf32>
    %37 = vector.extract_strided_slice %0 {offsets = [4, 0], sizes = [1, 64], strides = [1, 1]} : vector<8x128xf32> to vector<1x64xf32>
    %38 = vector.broadcast %37 : vector<1x64xf32> to vector<16x64xf32>
    %39 = arith.addf %36, %38 : vector<16x64xf32>
    %cst_21 = arith.constant 0.000000e+00 : f32
    %40 = vector.broadcast %cst_21 : f32 to vector<16x64xf32>
    %41 = arith.maximumf %39, %40 : vector<16x64xf32>
    %42 = arith.truncf %41 : vector<16x64xf32> to vector<16x64xbf16>
    %c0_22 = arith.constant 0 : index
    %c0_23 = arith.constant 0 : index
    %43 = vector.load %arg7[%c0_22, %c0_23] : memref<64x128xbf16, #tpu.memory_space<vmem>>, vector<64x128xbf16>
    %cst_24 = arith.constant dense<0.000000e+00> : vector<16x128xf32>
    %44 = tpu.matmul %42, %43, %cst_24 {dimension_numbers = #tpu.dot_dimension_numbers<[1], [0], [0], [1], [0, 0, 1, 1], [], []>} : vector<16x64xbf16>, vector<64x128xbf16>, vector<16x128xf32> -> vector<16x128xf32>
    %45 = vector.extract_strided_slice %0 {offsets = [5, 0], sizes = [1, 128], strides = [1, 1]} : vector<8x128xf32> to vector<1x128xf32>
    %46 = vector.broadcast %45 : vector<1x128xf32> to vector<16x128xf32>
    %47 = arith.addf %44, %46 : vector<16x128xf32>
    %cst_25 = arith.constant -3.000000e+01 : f32
    %cst_26 = arith.constant 3.000000e+01 : f32
    %48 = vector.broadcast %cst_25 : f32 to vector<16x128xf32>
    %49 = arith.maximumf %48, %47 : vector<16x128xf32>
    %50 = vector.broadcast %cst_26 : f32 to vector<16x128xf32>
    %51 = arith.minimumf %50, %49 : vector<16x128xf32>
    %cst_27 = arith.constant 0.000000e+00 : f32
    %52 = vector.broadcast %cst_27 : f32 to vector<16x128xf32>
    %53 = arith.subf %52, %51 : vector<16x128xf32>
    %54 = math.exp %53 : vector<16x128xf32>
    %cst_28 = arith.constant 1.000000e+00 : f32
    %55 = vector.broadcast %cst_28 : f32 to vector<16x128xf32>
    %56 = arith.addf %55, %54 : vector<16x128xf32>
    %57 = tpu.reciprocal %56 {approx = true} : vector<16x128xf32> -> vector<16x128xf32>
    %c0_29 = arith.constant 0 : index
    %c0_30 = arith.constant 0 : index
    %58 = vector.load %arg9[%c0_29, %c0_30] : memref<16x128xf32, #tpu.memory_space<vmem>>, vector<16x128xf32>
    tpu.vector_store %arg9[%c0_29, %c0_30], %57 {strides = array<i32>} : memref<16x128xf32, #tpu.memory_space<vmem>>, vector<16x128xf32>,
    return
  }
  func.func @transform_0(%arg0: i32) -> (i32, i32) {
    %c0_i32 = arith.constant 0 : i32
    %c0_i32_0 = arith.constant 0 : i32
    return %arg0, %c0_i32 : i32, i32
  }
  func.func @transform_1(%arg0: i32) -> (i32, i32) {
    %c0_i32 = arith.constant 0 : i32
    %c0_i32_0 = arith.constant 0 : i32
    %c0_i32_1 = arith.constant 0 : i32
    return %c0_i32, %c0_i32_0 : i32, i32
  }
  func.func @transform_2(%arg0: i32) -> (i32, i32) {
    %c0_i32 = arith.constant 0 : i32
    %c0_i32_0 = arith.constant 0 : i32
    %c0_i32_1 = arith.constant 0 : i32
    return %c0_i32, %c0_i32_0 : i32, i32
  }
  func.func @transform_3(%arg0: i32) -> (i32, i32) {
    %c0_i32 = arith.constant 0 : i32
    %c0_i32_0 = arith.constant 0 : i32
    %c0_i32_1 = arith.constant 0 : i32
    return %c0_i32, %c0_i32_0 : i32, i32
  }
  func.func @transform_4(%arg0: i32) -> (i32, i32) {
    %c0_i32 = arith.constant 0 : i32
    %c0_i32_0 = arith.constant 0 : i32
    %c0_i32_1 = arith.constant 0 : i32
    return %c0_i32, %c0_i32_0 : i32, i32
  }
  func.func @transform_5(%arg0: i32) -> (i32, i32) {
    %c0_i32 = arith.constant 0 : i32
    %c0_i32_0 = arith.constant 0 : i32
    %c0_i32_1 = arith.constant 0 : i32
    return %c0_i32, %c0_i32_0 : i32, i32
  }
  func.func @transform_6(%arg0: i32) -> (i32, i32) {
    %c0_i32 = arith.constant 0 : i32
    %c0_i32_0 = arith.constant 0 : i32
    %c0_i32_1 = arith.constant 0 : i32
    return %c0_i32, %c0_i32_0 : i32, i32
  }
  func.func @transform_7(%arg0: i32) -> (i32, i32) {
    %c0_i32 = arith.constant 0 : i32
    %c0_i32_0 = arith.constant 0 : i32
    %c0_i32_1 = arith.constant 0 : i32
    return %c0_i32, %c0_i32_0 : i32, i32
  }
  func.func @transform_8(%arg0: i32) -> (i32, i32) {
    %c0_i32 = arith.constant 0 : i32
    %c0_i32_0 = arith.constant 0 : i32
    return %arg0, %c0_i32 : i32, i32
  }
}

</mosaic_0001>

<bundles_post_ra>
// kernel: tpu_custom_call.1
= control target key start
LH: loop header
LB: loop body
LE: loop exit
PB: predicated region body
PF: predicated region fallthrough
CT: control target
= control target key end

     0   :  { %v715_v1 = vmov 0.0   ;;  %vm716_vm0 = vmmov 0   ;;  %s893_s0 = inlined_call_operand.vmem [shape: f32[16,128], index: 0, kind: input, shape index: {}]   ;;  %s894_s1 = inlined_call_operand.vmem [shape: bf16[128,64], index: 1, kind: input, shape index: {}]   ;;  %s895_s2 = inlined_call_operand.vmem [shape: bf16[64,32], index: 2, kind: input, shape index: {}]   ;;  %s896_s3 = inlined_call_operand.vmem [shape: bf16[32,16], index: 3, kind: input, shape index: {}]   ;;  %s897_s4 = inlined_call_operand.vmem [shape: bf16[16,32], index: 4, kind: input, shape index: {}]   ;;  %s898_s5 = inlined_call_operand.vmem [shape: bf16[32,64], index: 5, kind: input, shape index: {}]   ;;  %s899_s6 = inlined_call_operand.vmem [shape: bf16[64,128], index: 6, kind: input, shape index: {}]   ;;  %s900_s7 = inlined_call_operand.vmem [shape: f32[8,128], index: 7, kind: input, shape index: {}]   ;;  %s901_s8 = inlined_call_operand.hbm [shape: f32[16,128], index: 8, kind: output, shape index: {}]  }
   0x1   :  { %v664_v0 = vld [vmem:[%s894_s1 + $0x38] sm:$0xff]   ;;  %593 = vmatprep.subr.bf16.mxu0 %v715_v1  ;;  %613 = vmatprep.subr.bf16.mxu1 %v715_v1  ;;  %v665_v2 = vld [vmem:[%s894_s1 + $0x30] sm:$0xff]   ;;  %v666_v3 = vld [vmem:[%s894_s1 + $0x28] sm:$0xff]  }
   0x2   :  { %594 = vmatpush3.bf16.msra.mxu0 %v664_v0  ;;  %609 = vmatprep.mubr.msk.bf16.mxu0 %vm716_vm0, %v715_v1  ;;  %v667_v4 = vld [vmem:[%s894_s1 + $0x20] sm:$0xff]   ;;  %v672_v5 = vld [vmem:[%s895_s2 + $0x18] sm:$0xff]   ;;  %v669_v7 = vld [vmem:[%s894_s1 + $0x10] sm:$0xff]  }
   0x3   :  { %595 = vmatprep.subr.bf16.mxu0 %v715_v1  ;;  %621 = vmatprep.mubr.msk.bf16.mxu1 %vm716_vm0, %v715_v1  ;;  %v668_v6 = vld [vmem:[%s894_s1 + $0x18] sm:$0xff]  }
   0x4   :  { %614 = vmatpush3.bf16.msra.mxu1 %v672_v5 }
   0x5   :  { %615 = vmatprep.subr.bf16.mxu1 %v715_v1 }
   0x6   :  { %596 = vmatpush3.bf16.msra.mxu0 %v665_v2 }
   0x7   :  { %597 = vmatprep.subr.bf16.mxu0 %v715_v1 }
   0xa   :  { %598 = vmatpush3.bf16.msra.mxu0 %v666_v3 }
   0xb   :  { %599 = vmatprep.subr.bf16.mxu0 %v715_v1 }
   0xe   :  { %600 = vmatpush3.bf16.msra.mxu0 %v667_v4 }
   0xf   :  { %601 = vmatprep.subr.bf16.mxu0 %v715_v1 }
  0x12   :  { %602 = vmatpush3.bf16.msra.mxu0 %v668_v6 }
  0x13   :  { %13 = vsyncpa [#allocation3], 0  ;;  %603 = vmatprep.subr.bf16.mxu0 %v715_v1  ;;  %v670_v8 = vld [vmem:[%s894_s1 + $0x8] sm:$0xff]   ;;  %v671_v9 = vld [vmem:[%s894_s1] sm:$0xff]   ;;  %v51_v16 = vlaneseq  ;;  %vm183_vm1 = vcmask 523264   ;;  %vm251_vm2 = vcmask 261120  }
  0x14   :  { %v32_v10 = vld [vmem:[%s893_s0] sm:$0xff]  ;;  %v33_v11 = vld [vmem:[%s893_s0 + $0x8] sm:$0xff]  ;;  %v673_v13 = vld [vmem:[%s895_s2 + $0x10] sm:$0xff]   ;;  %vm311_vm3 = vcmask 130048  }
  0x15   :  { %v34_v12 = vpack.c.bf16 %v33_v11, %v32_v10  ;;  %616 = vmatpush3.bf16.msra.mxu1 %v673_v13  ;;  %v674_v14 = vld [vmem:[%s895_s2 + $0x8] sm:$0xff]   ;;  %v675_v15 = vld [vmem:[%s895_s2] sm:$0xff]   ;;  %v827_v17 = vshrl.u32 %v51_v16, 7  ;;  %v681_v57 = vld [vmem:[%s899_s6 + $0x18] sm:$0xff]  }
  0x16   :  { %604 = vmatpush3.bf16.msra.mxu0 %v669_v7  ;;  %617 = vmatprep.subr.bf16.mxu1 %v715_v1  ;;  %v833_v19 = vld [vmem:[%s900_s7] sm:$0xff]  ;;  %v676_v30 = vld [vmem:[%s896_s3 + $0x8] sm:$0xff]   ;;  %v682_v6 = vld [vmem:[%s899_s6 + $0x10] sm:$0xff]  }
  0x17   :  { %605 = vmatprep.subr.bf16.mxu0 %v715_v1  ;;  %v53_v18 = vsub.s32 0, %v827_v17  ;;  %v677_v31 = vld [vmem:[%s896_s3] sm:$0xff]   ;;  %v157_v32 = vsub.s32 1, %v827_v17  ;;  %v237_v44 = vsub.s32 2, %v827_v17  ;;  %v679_v55 = vld [vmem:[%s898_s5 + $0x8] sm:$0xff]   ;;  %v303_v58 = vsub.s32 3, %v827_v17 }
  0x18   :  { %v678_v43 = vld [vmem:[%s897_s4] sm:$0xff]   ;;  %v683_v7 = vld [vmem:[%s899_s6 + $0x8] sm:$0xff]  }
  0x19   :  { %618 = vmatpush3.bf16.msra.mxu1 %v674_v14  ;;  %v54_v20 = vrot.slane %v833_v19, %v53_v18  ;;  %v158_v33 = vrot.slane %v833_v19, %v157_v32  ;;  %v238_v45 = vrot.slane %v833_v19, %v237_v44  ;;  %v680_v56 = vld [vmem:[%s898_s5] sm:$0xff]   ;;  %v304_v59 = vrot.slane %v833_v19, %v303_v58 }
  0x1a   :  { %606 = vmatpush3.bf16.msra.mxu0 %v670_v8  ;;  %619 = vmatprep.subr.bf16.mxu1 %v715_v1  ;;  %v684_v8 = vld [vmem:[%s899_s6] sm:$0xff]   ;;  %s717_s6 = smov [#allocation2]  }
  0x1b   :  { %607 = vmatprep.subr.bf16.mxu0 %v715_v1  ;;  %s527_s24 = sshll.u32 %s717_s6, 4  ;;  %s528_s24 = int_to_ptr.vmem [resolvable:$true] %s527_s24 }
  0x1c   :  { %s693_s25 = scalar_lea.vmem %s528_s24, 256  ;;  %p698_p1 = scmp.lt.s32.totalorder %s528_s24, %s528_s24 }
  0x1d   :  { %620 = vmatpush3.bf16.msra.mxu1 %v675_v15  ;;  %p694_p0 = scmp.ne.s32.totalorder %s528_s24, %s693_s25  ;;  %p699_p2 = scmp.lt.s32.totalorder %s693_s25, %s693_s25 }
  0x1e   :  { %608 = vmatpush3.bf16.msra.mxu0 %v671_v9  ;;  %625 = vmatprep.subr.bf16.mxu1 %v715_v1  ;;  %v365_v9 = vsub.s32 4, %v827_v17 }
  0x1f   :  { %639 = vmatprep.subr.bf16.mxu0 %v715_v1  ;;  %p700_p3 = por %p699_p2, %p698_p1 }
  0x20   :  { %v366_v10 = vrot.slane %v833_v19, %v365_v9 }
  0x21   :  { %610 = vmatmul.mubr.bf16.vlgmr.msra.gmra.mxu0 %v34_v12  ;;  %p701_p4 = pnand %p700_p3, %p694_p0 }
  0x22   :  { %643 = vmatprep.mubr.msk.bf16.mxu0 %vm716_vm0, %v715_v1  ;;  %640 = vmatpush3.bf16.msra.mxu0 %v679_v55 }
  0x23   :  { %641 = vmatprep.subr.bf16.mxu0 %v715_v1 }
  0x26   :  { %642 = vmatpush3.bf16.msra.mxu0 %v680_v56 }
  0xe1   :  { %v137_v21 = vpop.f32.mrf.mxu0 }
  0xe2   :  { %v138_v23 = vadd.f32 %v137_v21, %v54_v20 }
  0xe3   :  { %v611_v22 = vpop.f32.mrf.mxu0 }
  0xe4   :  { %v144_v27 = vmax.f32 %v138_v23, 0.0 }
  0xe5   :  { %v140_v24 = vpop.f32.mrf.mxu0 }
  0xe6   :  { %v141_v25 = vadd.f32 %v140_v24, %v54_v20 }
  0xe7   :  { %v612_v26 = vpop.f32.mrf.mxu0 }
  0xe8   :  { %v145_v28 = vmax.f32 %v141_v25, 0.0 }
  0xea   :  { %v146_v29 = vpack.c.bf16 %v145_v28, %v144_v27 }
  0xec   :  { %622 = vmatmul.mubr.msk.bf16.vlgmr.msra.gmra.mxu1 %vm183_vm1, %v146_v29 }
  0xed   :  { %629 = vmatprep.mubr.msk.bf16.mxu1 %vm716_vm0, %v715_v1  ;;  %626 = vmatpush3.bf16.msra.mxu1 %v676_v30 }
  0xee   :  { %627 = vmatprep.subr.bf16.mxu1 %v715_v1 }
  0xf1   :  { %628 = vmatpush3.bf16.msra.mxu1 %v677_v31 }
  0xf2   :  { %633 = vmatprep.subr.bf16.mxu1 %v715_v1 }
 0x1ac   :  { %v221_v34 = vpop.f32.mrf.mxu1 }
 0x1ad   :  { %v222_v36 = vadd.f32 %v221_v34, %v158_v33 }
 0x1ae   :  { %v623_v35 = vpop.f32.mrf.mxu1 }
 0x1af   :  { %v228_v40 = vmax.f32 %v222_v36, 0.0 }
 0x1b0   :  { %v224_v37 = vpop.f32.mrf.mxu1 }
 0x1b1   :  { %v225_v38 = vadd.f32 %v224_v37, %v158_v33 }
 0x1b2   :  { %v624_v39 = vpop.f32.mrf.mxu1 }
 0x1b3   :  { %v229_v41 = vmax.f32 %v225_v38, 0.0 }
 0x1b5   :  { %v230_v42 = vpack.c.bf16 %v229_v41, %v228_v40 }
 0x1b7   :  { %630 = vmatmul.mubr.msk.bf16.vlgmr.msra.gmra.mxu1 %vm251_vm2, %v230_v42 }
 0x1b8   :  { %635 = vmatprep.mubr.msk.bf16.mxu1 %vm716_vm0, %v715_v1  ;;  %634 = vmatpush3.bf16.msra.mxu1 %v678_v43 }
 0x1b9   :  { %647 = vmatprep.subr.bf16.mxu1 %v715_v1 }
 0x277   :  { %v289_v46 = vpop.f32.mrf.mxu1 }
 0x278   :  { %v290_v48 = vadd.f32 %v289_v46, %v238_v45 }
 0x279   :  { %v631_v47 = vpop.f32.mrf.mxu1 }
 0x27a   :  { %v296_v52 = vmax.f32 %v290_v48, 0.0 }
 0x27b   :  { %v292_v49 = vpop.f32.mrf.mxu1 }
 0x27c   :  { %v293_v50 = vadd.f32 %v292_v49, %v238_v45 }
 0x27d   :  { %v632_v51 = vpop.f32.mrf.mxu1 }
 0x27e   :  { %v297_v53 = vmax.f32 %v293_v50, 0.0 }
 0x280   :  { %v298_v54 = vpack.c.bf16 %v297_v53, %v296_v52 }
 0x282   :  { %636 = vmatmul.mubr.msk.bf16.vlgmr.msra.gmra.mxu1 %vm311_vm3, %v298_v54 }
 0x283   :  { %655 = vmatprep.mubr.msk.bf16.mxu1 %vm716_vm0, %v715_v1  ;;  %648 = vmatpush3.bf16.msra.mxu1 %v681_v57 }
 0x284   :  { %649 = vmatprep.subr.bf16.mxu1 %v715_v1 }
 0x287   :  { %650 = vmatpush3.bf16.msra.mxu1 %v682_v6 }
 0x288   :  { %651 = vmatprep.subr.bf16.mxu1 %v715_v1 }
 0x28b   :  { %652 = vmatpush3.bf16.msra.mxu1 %v683_v7 }
 0x28c   :  { %653 = vmatprep.subr.bf16.mxu1 %v715_v1  ;;  %v436_v1 = vsub.s32 5, %v827_v17 }
 0x28e   :  { %v437_v22 = vrot.slane %v833_v19, %v436_v1 }
 0x28f   :  { %654 = vmatpush3.bf16.msra.mxu1 %v684_v8 }
 0x342   :  { %v349_v60 = vpop.f32.mrf.mxu1 }
 0x343   :  { %v350_v62 = vadd.f32 %v349_v60, %v304_v59 }
 0x344   :  { %v637_v61 = vpop.f32.mrf.mxu1 }
 0x345   :  { %v356_v3 = vmax.f32 %v350_v62, 0.0 }
 0x346   :  { %v352_v63 = vpop.f32.mrf.mxu1 }
 0x347   :  { %v353_v0 = vadd.f32 %v352_v63, %v304_v59 }
 0x348   :  { %v638_v2 = vpop.f32.mrf.mxu1 }
 0x349   :  { %v357_v4 = vmax.f32 %v353_v0, 0.0 }
 0x34b   :  { %v358_v5 = vpack.c.bf16 %v357_v4, %v356_v3 }
 0x34d   :  { %644 = vmatmul.mubr.msk.bf16.vlgmr.msra.gmra.mxu0 %vm251_vm2, %v358_v5 }
 0x40d   :  { %v416_v11 = vpop.f32.mrf.mxu0 }
 0x40e   :  { %v417_v13 = vadd.f32 %v416_v11, %v366_v10 }
 0x40f   :  { %v645_v12 = vpop.f32.mrf.mxu0 }
 0x410   :  { %v423_v18 = vmax.f32 %v417_v13, 0.0 }
 0x411   :  { %v419_v14 = vpop.f32.mrf.mxu0 }
 0x412   :  { %v420_v15 = vadd.f32 %v419_v14, %v366_v10 }
 0x413   :  { %v646_v16 = vpop.f32.mrf.mxu0 }
 0x414   :  { %v424_v20 = vmax.f32 %v420_v15, 0.0 }
 0x416   :  { %v425_v21 = vpack.c.bf16 %v424_v20, %v423_v18 }
 0x418   :  { %656 = vmatmul.mubr.msk.bf16.vlgmr.msra.gmra.mxu1 %vm183_vm1, %v425_v21 }
 0x4d8   :  { %v499_v23 = vpop.f32.mrf.mxu1 }
 0x4d9   :  { %v500_v24 = vadd.f32 %v499_v23, %v437_v22 }
 0x4da   :  { %v657_v25 = vpop.f32.mrf.mxu1 }
 0x4db   :  { %v564_v26 = vclamps-f32 %v500_v24, 30.0 }
 0x4dc   :  { %v502_v27 = vpop.f32.mrf.mxu1 }
 0x4dd   :  { %v510_v28 = vsub.f32 0.0, %v564_v26  ;;  %v503_v29 = vadd.f32 %v502_v27, %v437_v22 }
 0x4de   :  { %v658_v30 = vpop.f32.mrf.mxu1 }
 0x4df   :  { %v512_v31 = vmul.f32 1.442695, %v510_v28  ;;  %v565_v32 = vclamps-f32 %v503_v29, 30.0 }
 0x4e1   :  { %685 = vpow2.f32 %v512_v31  ;;  %v511_v33 = vsub.f32 0.0, %v565_v32 }
 0x4e3   :  { %v514_v34 = vmul.f32 1.442695, %v511_v33 }
 0x4e5   :  { %687 = vpow2.f32 %v514_v34 }
 0x4ee   :  { %v686_v35 = vpop.eup %685 }
 0x4ef   :  { %v516_v36 = vadd.f32 1.0, %v686_v35 }
 0x4f1   :  { %689 = vrcp.f32 %v516_v36 }
 0x4f2   :  { %v688_v17 = vpop.eup %687 }
 0x4f3   :  { %v517_v37 = vadd.f32 1.0, %v688_v17 }
 0x4f5   :  { %691 = vrcp.f32 %v517_v37 }
 0x4fe   :  { %v690_v19 = vpop.eup %689 }
 0x4ff   :  { %520 = vst [vmem:[#allocation2] sm:$0xff] %v690_v19 }
 0x502   :  { %v692_v38 = vpop.eup %691 }
 0x503   :  { %521 = vst [vmem:[#allocation2 + $0x8] sm:$0xff] %v692_v38 }
 0x504   :  { %704 = shalt.err (!%p701_p4)
}
 0x505   :  { %s718_s26 = smov 128   ;;  %s719_s27 = smov 8  }
 0x506   :  { %533 = dma.vmem_to_hbm [thread:$0]  %s528_s24, 256, %s901_s8, [#allocation3], %s718_s26, %s718_s26, %s719_s27  }
 0x507   :  { %713 = dma.done.wait [#allocation3], 256  }
 0x508   :  { %714 = vsyncadd [#allocation3], 4294967040 }
 0x509   :  { %537 = vsyncpa [#allocation3], 1 }

</bundles_post_ra>
